<compile_context>
chip_gen: v7x
topology: tpu7x:2x2x1
jax: 0.10.0
libtpu: 0.0.40
codegen_flags: <defaults>
</compile_context>

<pallas_src>
import jax
import jax.numpy as jnp
from jax.experimental import pallas as pl
from jax.experimental.pallas import tpu as pltpu


# ---------------------------------------------------------------------------
# helpers
# ---------------------------------------------------------------------------
def _round_up(v, m):
    return -(-v // m) * m


def _sublane(dtype):
    return {4: 8, 2: 16, 1: 32}.get(jnp.dtype(dtype).itemsize, 8)


def _pick_tile(dim, align, max_tile):
    """(tile, padded_dim): full extent if small, else balanced aligned blocks."""
    d_p = _round_up(dim, align)
    if d_p <= max_tile:
        return d_p, d_p
    n_blocks = -(-d_p // max_tile)
    tile = _round_up(-(-d_p // n_blocks), align)
    return tile, tile * n_blocks


# ---------------------------------------------------------------------------
# kernels
# ---------------------------------------------------------------------------
def _scalar_fma_kernel(x_ref, w_ref, b_ref, o_ref):
    # x_ref: (tr, 128) sublane-filled, lane-dense batch; w/b: (1, 1). Pure VPU.
    x = x_ref[...].astype(jnp.float32)
    w = w_ref[...].astype(jnp.float32)
    b = b_ref[...].astype(jnp.float32)
    o_ref[...] = (x * w + b).astype(o_ref.dtype)


def _rowreduce_kernel(x_ref, w_ref, b_ref, o_ref):
    # out_features == 1: y = sum_k x[:, k] * w[k] + b.  VPU multiply + XLU
    # lane reduce; no MXU (it would be >99% padding for a 1-wide output).
    x = x_ref[...].astype(jnp.float32)                 # (tm, K)
    w = w_ref[...].astype(jnp.float32)                 # (1, K)
    acc = jnp.sum(x * w, axis=1, keepdims=True)        # (tm, 1)
    o_ref[...] = (acc + b_ref[...].astype(jnp.float32)).astype(o_ref.dtype)


def _linear_kernel(x_ref, wt_ref, b_ref, o_ref):
    # Single-K-step MXU matmul: no scratch accumulator, no pl.when branches.
    o_ref[...] = (
        jnp.dot(x_ref[...], wt_ref[...], preferred_element_type=jnp.float32)
        + b_ref[...].astype(jnp.float32)
    ).astype(o_ref.dtype)


def _linear_acc_kernel(x_ref, wt_ref, b_ref, o_ref, acc_ref):
    # Multi-K-step path (K > 2048): f32 VMEM accumulator, bias added once.
    k = pl.program_id(2)

    @pl.when(k == 0)
    def _init():
        acc_ref[...] = jnp.zeros_like(acc_ref)

    acc_ref[...] += jnp.dot(
        x_ref[...], wt_ref[...], preferred_element_type=jnp.float32
    )

    @pl.when(k == pl.num_programs(2) - 1)
    def _finalize():
        o_ref[...] = (acc_ref[...] + b_ref[...].astype(jnp.float32)).astype(o_ref.dtype)


# ---------------------------------------------------------------------------
# module wrapper: caches K-major / padded weights at construction time
# ---------------------------------------------------------------------------
_MAX_FULL_K = 2048     # full-K tile if K <= this (fits comfortably in VMEM)
_TK_TILED = 512        # K tile when K is split
_MAX_TM = 512
_MAX_TN = 512


class PallasLR:
    """Pallas equivalent of the PyTorch LR module (y = x @ W^T + b).

    Weight prep (K-major transpose + padding) is done once here and cached,
    so the per-call hot path only pads x (if needed) and runs the kernel.
    """

    def __init__(self, weight, bias):
        weight = jnp.asarray(weight)
        bias = jnp.asarray(bias)
        self.out_f, self.in_f = weight.shape
        self.weight = weight
        self.bias = bias

        if self.out_f == 1 and self.in_f == 1:
            self._mode = "scalar"
            self._w11 = weight.reshape(1, 1)
            self._b11 = bias.reshape(1, 1)
        elif self.out_f == 1 and self.in_f <= _MAX_FULL_K:
            self._mode = "rowreduce"
            self._w_row = weight.reshape(1, self.in_f)
            self._b11 = bias.reshape(1, 1)
        else:
            self._mode = "matmul"
            if self.in_f <= _MAX_FULL_K:
                self._tk, self._k_p = self.in_f, self.in_f        # full-K, no pad
            else:
                self._tk = _TK_TILED
                self._k_p = _round_up(self.in_f, _TK_TILED)
            self._tn, self._o_p = _pick_tile(self.out_f, 128, _MAX_TN)
            w_t = weight.T                                         # (in_f, out_f)
            if (self._k_p, self._o_p) != w_t.shape:
                w_t = jnp.pad(w_t, ((0, self._k_p - self.in_f),
                                    (0, self._o_p - self.out_f)))
            self._w_t = w_t
            b = bias if self._o_p == self.out_f else jnp.pad(
                bias, (0, self._o_p - self.out_f))
            self._b = b.reshape(1, self._o_p)

    # -- dispatch ----------------------------------------------------------
    def __call__(self, x):
        assert x.ndim == 2 and x.shape[1] == self.in_f
        if self._mode == "scalar":
            return self._scalar_forward(x)
        if self._mode == "rowreduce":
            return self._rowreduce_forward(x)
        return self._matmul_forward(x)

    # -- tiny path: in_features == out_features == 1 ------------------------
    def _scalar_forward(self, x):
        n = x.shape[0]
        lanes = 128
        rows = -(-n // lanes)
        tr, rows_p = _pick_tile(rows, _sublane(x.dtype), _MAX_TM)
        total = rows_p * lanes
        x_flat = x.reshape(-1)
        if total != n:
            x_flat = jnp.pad(x_flat, (0, total - n))
        x2 = x_flat.reshape(rows_p, lanes)

        out = pl.pallas_call(
            _scalar_fma_kernel,
            out_shape=jax.ShapeDtypeStruct((rows_p, lanes), x.dtype),
            grid_spec=pltpu.PrefetchScalarGridSpec(
                num_scalar_prefetch=0,
                grid=(rows_p // tr,),
                in_specs=[
                    pl.BlockSpec((tr, lanes), lambda i: (i, 0)),
                    pl.BlockSpec((1, 1), lambda i: (0, 0)),
                    pl.BlockSpec((1, 1), lambda i: (0, 0)),
                ],
                out_specs=pl.BlockSpec((tr, lanes), lambda i: (i, 0)),
            ),
            compiler_params=pltpu.CompilerParams(
                dimension_semantics=("parallel",)),
            cost_estimate=pl.CostEstimate(
                flops=2 * n, transcendentals=0,
                bytes_accessed=(2 * n + 2) * jnp.dtype(x.dtype).itemsize),
        )(x2, self._w11, self._b11)
        return out.reshape(-1)[:n].reshape(n, 1)

    # -- matrix-vector path: out_features == 1, in_features > 1 -------------
    def _rowreduce_forward(self, x):
        n = x.shape[0]
        tm, n_p = _pick_tile(n, _sublane(x.dtype), 256)
        x_p = x if n_p == n else jnp.pad(x, ((0, n_p - n), (0, 0)))

        out = pl.pallas_call(
            _rowreduce_kernel,
            out_shape=jax.ShapeDtypeStruct((n_p, 1), x.dtype),
            grid_spec=pltpu.PrefetchScalarGridSpec(
                num_scalar_prefetch=0,
                grid=(n_p // tm,),
                in_specs=[
                    pl.BlockSpec((tm, self.in_f), lambda i: (i, 0)),
                    pl.BlockSpec((1, self.in_f), lambda i: (0, 0)),
                    pl.BlockSpec((1, 1), lambda i: (0, 0)),
                ],
                out_specs=pl.BlockSpec((tm, 1), lambda i: (i, 0)),
            ),
            compiler_params=pltpu.CompilerParams(
                dimension_semantics=("parallel",)),
            cost_estimate=pl.CostEstimate(
                flops=2 * n * self.in_f, transcendentals=0,
                bytes_accessed=(n * self.in_f + self.in_f + n + 1)
                * jnp.dtype(x.dtype).itemsize),
        )(x_p, self._w_row, self._b11)
        return out[:n]

    # -- general path: tiled MXU matmul --------------------------------------
    def _matmul_forward(self, x):
        n = x.shape[0]
        sub = _sublane(x.dtype)
        tm, n_p = _pick_tile(n, sub, _MAX_TM)
        tn, o_p = self._tn, self._o_p
        tk, k_p = self._tk, self._k_p

        # v7x: make sure both TensorCores get work when the (i, j) grid would
        # otherwise be (1, 1).  Harmless (still one TC) on v5e/v6e.
        if (n_p // tm == 1) and (o_p // tn == 1):
            if o_p % 256 == 0:
                tn = o_p // 2                      # still a multiple of 128
            elif n_p % (2 * sub) == 0:
                tm = n_p // 2                      # still a multiple of sub

        grid_i, grid_j, grid_k = n_p // tm, o_p // tn, k_p // tk

        x_p = x
        if (n_p, k_p) != x.shape:
            x_p = jnp.pad(x, ((0, n_p - n), (0, k_p - self.in_f)))

        itemsize = jnp.dtype(x.dtype).itemsize
        cost = pl.CostEstimate(
            flops=2 * n * self.in_f * self.out_f,
            transcendentals=0,
            bytes_accessed=(n * self.in_f + self.in_f * self.out_f
                            + n * self.out_f + self.out_f) * itemsize,
        )
        dims = ("parallel", "parallel") + (("arbitrary",) if grid_k > 1 else ())
        cparams = pltpu.CompilerParams(
            dimension_semantics=dims,
            vmem_limit_bytes=32 * 1024 * 1024,   # above v5e's 16 MiB scoped default
        )

        if grid_k == 1:
            out = pl.pallas_call(
                _linear_kernel,
                out_shape=jax.ShapeDtypeStruct((n_p, o_p), x.dtype),
                grid_spec=pltpu.PrefetchScalarGridSpec(
                    num_scalar_prefetch=0,
                    grid=(grid_i, grid_j),
                    in_specs=[
                        pl.BlockSpec((tm, tk), lambda i, j: (i, 0)),
                        pl.BlockSpec((tk, tn), lambda i, j: (0, j)),
                        pl.BlockSpec((1, tn), lambda i, j: (0, j)),
                    ],
                    out_specs=pl.BlockSpec((tm, tn), lambda i, j: (i, j)),
                ),
                compiler_params=cparams,
                cost_estimate=cost,
            )(x_p, self._w_t, self._b)
        else:
            out = pl.pallas_call(
                _linear_acc_kernel,
                out_shape=jax.ShapeDtypeStruct((n_p, o_p), x.dtype),
                grid_spec=pltpu.PrefetchScalarGridSpec(
                    num_scalar_prefetch=0,
                    grid=(grid_i, grid_j, grid_k),
                    in_specs=[
                        pl.BlockSpec((tm, tk), lambda i, j, k: (i, k)),
                        pl.BlockSpec((tk, tn), lambda i, j, k: (k, j)),
                        pl.BlockSpec((1, tn), lambda i, j, k: (0, j)),
                    ],
                    out_specs=pl.BlockSpec((tm, tn), lambda i, j, k: (i, j)),
                    scratch_shapes=[pltpu.VMEM((tm, tn), jnp.float32)],
                ),
                compiler_params=cparams,
                cost_estimate=cost,
            )(x_p, self._w_t, self._b)
        return out[:n, :self.out_f]


def lr_forward(x, weight, bias):
    """Functional form (builds the prep each call; prefer PallasLR to cache it)."""
    return PallasLR(weight, bias)(x)


# ---------------------------------------------------------------------------
# self-test
# ---------------------------------------------------------------------------
if __name__ == "__main__":
    key = jax.random.PRNGKey(0)
    keys = jax.random.split(key, 12)

    # --- Case 1: module defaults LR(input_size=1, output_size=1) — tiny path.
    n1 = 8
    x1 = jax.random.normal(keys[0], (n1, 1), dtype=jnp.float32)
    w1 = jax.random.normal(keys[1], (1, 1), dtype=jnp.float32)
    b1 = jax.random.normal(keys[2], (1,), dtype=jnp.float32)
    m1 = PallasLR(w1, b1)
    y1 = m1(x1)
    jax.block_until_ready(y1)
    assert y1.shape == (n1, 1)
    assert jnp.allclose(y1, x1 @ w1.T + b1, atol=1e-5), "scalar-path mismatch"

    # --- Case 2: LR(32, 1), batch=64 — lane-reduce (matrix-vector) path.
    n2, k2 = 64, 32
    x2 = jax.random.normal(keys[3], (n2, k2), dtype=jnp.float32)
    w2 = jax.random.normal(keys[4], (1, k2), dtype=jnp.float32)
    b2 = jax.random.normal(keys[5], (1,), dtype=jnp.float32)
    m2 = PallasLR(w2, b2)
    y2 = m2(x2)
    jax.block_until_ready(y2)
    assert y2.shape == (n2, 1)
    assert jnp.allclose(y2, x2 @ w2.T + b2, atol=1e-4), "rowreduce-path mismatch"

    # --- Case 3: LR(384, 256), batch=320, bf16 — single-K-step MXU path
    #             (tm=320, full-K tk=384, N split into two 128-wide tiles).
    n3, k3, o3 = 320, 384, 256
    x3 = jax.random.normal(keys[6], (n3, k3), jnp.float32).astype(jnp.bfloat16)
    w3 = jax.random.normal(keys[7], (o3, k3), jnp.float32).astype(jnp.bfloat16)
    b3 = jax.random.normal(keys[8], (o3,), jnp.float32).astype(jnp.bfloat16)
    m3 = PallasLR(w3, b3)
    y3 = m3(x3)
    jax.block_until_ready(y3)
    ref3 = x3.astype(jnp.float32) @ w3.astype(jnp.float32).T + b3.astype(jnp.float32)
    assert y3.shape == (n3, o3)
    assert jnp.allclose(y3.astype(jnp.float32), ref3, rtol=2e-2, atol=5e-2), \
        "single-K MXU path mismatch"

    # --- Case 4: LR(2560, 128), batch=16, bf16 — multi-K-step accumulator path.
    n4, k4, o4 = 16, 2560, 128
    x4 = jax.random.normal(keys[9], (n4, k4), jnp.float32).astype(jnp.bfloat16)
    w4 = jax.random.normal(keys[10], (o4, k4), jnp.float32).astype(jnp.bfloat16)
    b4 = jax.random.normal(keys[11], (o4,), jnp.float32).astype(jnp.bfloat16)
    m4 = PallasLR(w4, b4)
    y4 = m4(x4)
    jax.block_until_ready(y4)
    ref4 = x4.astype(jnp.float32) @ w4.astype(jnp.float32).T + b4.astype(jnp.float32)
    assert y4.shape == (n4, o4)
    assert jnp.allclose(y4.astype(jnp.float32), ref4, rtol=3e-2, atol=5e-1), \
        "multi-K accumulator path mismatch"

    print("KERNEL_OK")
</pallas_src>

<mosaic_0001>
module attributes {stable_mosaic.version = 11 : i64} {
  func.func @_scalar_fma_kernel(%arg0: i32, %arg1: memref<8x128xf32, #tpu.memory_space<vmem>>, %arg2: memref<1x1xf32, #tpu.memory_space<vmem>>, %arg3: memref<1x1xf32, #tpu.memory_space<vmem>>, %arg4: memref<8x128xf32, #tpu.memory_space<vmem>>) attributes {dimension_semantics = [#tpu.dimension_semantics<parallel>], iteration_bounds = array<i64: 1>, scalar_prefetch = 0 : i64, scratch_operands = 0 : i64, tpu.core_type = #tpu.core_type<tc>, window_params = [{transform_indices = @transform_0, window_bounds = array<i64: 8, 128>}, {pipeline_mode = #tpu.pipeline_mode<synchronous>, transform_indices = @transform_1, window_bounds = array<i64: 1, 1>}, {pipeline_mode = #tpu.pipeline_mode<synchronous>, transform_indices = @transform_2, window_bounds = array<i64: 1, 1>}, {transform_indices = @transform_3, window_bounds = array<i64: 8, 128>}]} {
    %c0 = arith.constant 0 : index
    %c0_0 = arith.constant 0 : index
    %0 = vector.load %arg1[%c0, %c0_0] : memref<8x128xf32, #tpu.memory_space<vmem>>, vector<8x128xf32>
    %c0_1 = arith.constant 0 : index
    %c0_2 = arith.constant 0 : index
    %1 = vector.load %arg2[%c0_1, %c0_2] : memref<1x1xf32, #tpu.memory_space<vmem>>, vector<1x1xf32>
    %c0_3 = arith.constant 0 : index
    %c0_4 = arith.constant 0 : index
    %2 = vector.load %arg3[%c0_3, %c0_4] : memref<1x1xf32, #tpu.memory_space<vmem>>, vector<1x1xf32>
    %3 = vector.broadcast %1 : vector<1x1xf32> to vector<8x128xf32>
    %4 = arith.mulf %0, %3 : vector<8x128xf32>
    %5 = vector.broadcast %2 : vector<1x1xf32> to vector<8x128xf32>
    %6 = arith.addf %4, %5 : vector<8x128xf32>
    %c0_5 = arith.constant 0 : index
    %c0_6 = arith.constant 0 : index
    %7 = vector.load %arg4[%c0_5, %c0_6] : memref<8x128xf32, #tpu.memory_space<vmem>>, vector<8x128xf32>
    tpu.vector_store %arg4[%c0_5, %c0_6], %6 {strides = array<i32>} : memref<8x128xf32, #tpu.memory_space<vmem>>, vector<8x128xf32>,
    return
  }
  func.func @transform_0(%arg0: i32) -> (i32, i32) {
    %c0_i32 = arith.constant 0 : i32
    %c0_i32_0 = arith.constant 0 : i32
    return %arg0, %c0_i32 : i32, i32
  }
  func.func @transform_1(%arg0: i32) -> (i32, i32) {
    %c0_i32 = arith.constant 0 : i32
    %c0_i32_0 = arith.constant 0 : i32
    %c0_i32_1 = arith.constant 0 : i32
    return %c0_i32, %c0_i32_0 : i32, i32
  }
  func.func @transform_2(%arg0: i32) -> (i32, i32) {
    %c0_i32 = arith.constant 0 : i32
    %c0_i32_0 = arith.constant 0 : i32
    %c0_i32_1 = arith.constant 0 : i32
    return %c0_i32, %c0_i32_0 : i32, i32
  }
  func.func @transform_3(%arg0: i32) -> (i32, i32) {
    %c0_i32 = arith.constant 0 : i32
    %c0_i32_0 = arith.constant 0 : i32
    return %arg0, %c0_i32 : i32, i32
  }
}

</mosaic_0001>

<bundles_post_ra>
// kernel: tpu_custom_call.1
= control target key start
LH: loop header
LB: loop body
LE: loop exit
PB: predicated region body
PF: predicated region fallthrough
CT: control target
= control target key end

     0   :  { %s177_s0 = inlined_call_operand.hbm [shape: f32[8,128], index: 0, kind: input, shape index: {}]   ;;  %s178_s1 = inlined_call_operand.<no memory space> [shape: f32[1,1], index: 1, kind: input, shape index: {}]   ;;  %s179_s3 = inlined_call_operand.hbm [shape: f32[8,128], index: 3, kind: output, shape index: {}]   ;;  %s180_s2 = inlined_call_operand.<no memory space> [shape: f32[1,1], index: 2, kind: input, shape index: {}]  }
   0x1   :  { %v8_v0 = vstv %s178_s1  ;;  %v10_v1 = vstv %s180_s2 }
   0x2   :  { %9 = vst [vmem:[#allocation2] sm:$0x1] %v8_v0  ;;  %11 = vst [vmem:[#allocation3] sm:$0x1] %v10_v1 }
   0x3   :  { %12 = vsyncpa [#allocation5], 0 }
   0x4   :  { %13 = vsyncpa [#allocation6], 0  ;;  %s124_s16 = smov [#allocation4]   ;;  %s76_s20 = scalar_lea.hbm %s177_s0, 128 }
   0x5   :  { %s20_s17 = sshll.u32 %s124_s16, 4  ;;  %p77_p0 = scmp.ne.s32.totalorder %s177_s0, %s76_s20  ;;  %s21_s17 = int_to_ptr.vmem [resolvable:$true] %s20_s17 }
   0x6   :  { %p80_p1 = scmp.lt.u32.totalorder %s76_s20, %s177_s0 }
   0x8   :  { %p82_p2 = pnand %p80_p1, %p77_p0 }
   0xa   :  { %85 = shalt.err (!%p82_p2)
}
   0xb   :  { %s86_s2 = scalar_lea.vmem %s21_s17, 128  ;;  %p91_p4 = scmp.lt.s32.totalorder %s21_s17, %s21_s17 }
   0xc   :  { %p87_p3 = scmp.ne.s32.totalorder %s21_s17, %s86_s2  ;;  %p92_p5 = scmp.lt.s32.totalorder %s86_s2, %s86_s2 }
   0xe   :  { %p93_p6 = por %p92_p5, %p91_p4 }
  0x10   :  { %p94_p7 = pnand %p93_p6, %p87_p3 }
  0x12   :  { %97 = shalt.err (!%p94_p7)
}
  0x13   :  { %23 = dma.hbm_to_vmem [thread:$0]  %s177_s0, 128, %s21_s17, [#allocation5]  }
  0x14   :  { %120 = dma.done.wait [#allocation5], 128  }
  0x15   :  { %121 = vsyncadd [#allocation5], 4294967168  ;;  %v125_v2 = vmov 0   ;;  %v70_v3 = vld [vmem:[#allocation2] ss:$0 sm:$0xff]  ;;  %v31_v6 = vld [vmem:[#allocation4] sm:$0xff] }
  0x16   :  { %75 = vset.pattern.permute.xlu0 %v125_v2  ;;  %v71_v4 = vld [vmem:[#allocation3] ss:$0 sm:$0xff]  ;;  %s126_s26 = smov [#allocation7]  }
  0x17   :  { %40 = vperm.xlu0 %75, %v70_v3   ;;  %s61_s27 = sshll.u32 %s126_s26, 4  ;;  %s62_s27 = int_to_ptr.vmem [resolvable:$true] %s61_s27 }
  0x18   :  { %s98_s28 = scalar_lea.vmem %s62_s27, 128  ;;  %p103_p9 = scmp.lt.s32.totalorder %s62_s27, %s62_s27 }
  0x19   :  { %p99_p8 = scmp.ne.s32.totalorder %s62_s27, %s98_s28  ;;  %p104_p10 = scmp.lt.s32.totalorder %s98_s28, %s98_s28 }
  0x1b   :  { %50 = vperm.xlu0 %75, %v71_v4   ;;  %p105_p11 = por %p104_p10, %p103_p9 }
  0x1d   :  { %p106_p12 = pnand %p105_p11, %p99_p8 }
  0x96   :  { %v41_v5 = vpop.permute.xlu0 %40 }
  0x97   :  { %v43_v7 = vmul.f32 %v41_v5, %v31_v6 }
  0x9a   :  { %v51_v8 = vpop.permute.xlu0 %50 }
  0x9b   :  { %v53_v9 = vadd.f32 %v51_v8, %v43_v7 }
  0x9d   :  { %54 = vst [vmem:[#allocation7] sm:$0xff] %v53_v9 }
  0x9e   :  { %109 = shalt.err (!%p106_p12)
}
  0x9f   :  { %s110_s30 = scalar_lea.hbm %s179_s3, 128 }
  0xa0   :  { %p111_p13 = scmp.ne.s32.totalorder %s179_s3, %s110_s30  ;;  %p114_p0 = scmp.lt.u32.totalorder %s110_s30, %s179_s3 }
  0xa2   :  { %p116_p1 = pnand %p114_p0, %p111_p13 }
  0xa4   :  { %119 = shalt.err (!%p116_p1)
}
  0xa5   :  { %64 = dma.vmem_to_hbm [thread:$0]  %s62_s27, 128, %s179_s3, [#allocation6]  }
  0xa6   :  { %122 = dma.done.wait [#allocation6], 128  }
  0xa7   :  { %123 = vsyncadd [#allocation6], 4294967168 }
  0xa8   :  { %68 = vsyncpa [#allocation5], 1 }
  0xa9   :  { %69 = vsyncpa [#allocation6], 1 }

</bundles_post_ra>
